<compile_context>
chip_gen: v5e
topology: v5e:2x2
jax: 0.10.0
libtpu: 0.0.40
codegen_flags: <defaults>
</compile_context>

<pallas_src>
import functools

import jax
import jax.numpy as jnp
from jax import lax
from jax.experimental import pallas as pl
from jax.experimental.pallas import tpu as pltpu

LANES = 128


def _guess_num_tensorcores():
    """Best-effort TensorCore count (v7x=2, v5e/v6e=1).

    A grid axis of size 2 runs serially (and correctly) on 1-TC chips, so the
    fallback of 2 is harmless everywhere and captures the 2x on v7x.
    """
    try:
        info = pltpu.get_tpu_info()
        for name in ("num_cores", "core_count", "num_tensorcores",
                     "tensorcores_per_chip", "num_tensor_cores"):
            v = getattr(info, name, None)
            if isinstance(v, int) and 1 <= v <= 16:
                return v
    except Exception:
        pass
    return 2


def _focal_huber_kernel(yp_ref, yt_ref, out_ref, *, delta, alpha, gamma,
                        block_rows, rows, mask_start_block):
    i = pl.program_id(1)  # reduction ("arbitrary") axis

    @pl.when(i == 0)
    def _init():
        out_ref[...] = jnp.zeros_like(out_ref)

    yp = yp_ref[...].astype(jnp.float32)
    yt = yt_ref[...].astype(jnp.float32)

    error = jnp.abs(yt - yp)
    w = 1.0 - jnp.exp(-alpha * error)
    if gamma == 2.0:            # default: square on the VPU, 1 EUP op total
        weight = w * w
    elif gamma == 1.0:
        weight = w
    else:                       # general gamma; clamp base to avoid log(0) NaN
        weight = jnp.power(jnp.maximum(w, 1e-30), gamma)

    quadratic = 0.5 * (error * error)
    linear = delta * (error - 0.5 * delta)
    contrib = weight * jnp.where(error < delta, quadratic, linear)

    def fold(x):
        # (block_rows,128) -> (8,128): leading-dim split (layout-trivial w.r.t.
        # the (8,128) tile) + pure-VPU adds along the group axis.
        return x.reshape(block_rows // 8, 8, LANES).sum(axis=0)

    if mask_start_block is None:
        # No ragged last block, no overshoot blocks: unmasked fast path only.
        out_ref[...] += fold(contrib)
    else:
        # Virtual (unclamped) global block id.
        gb = pl.program_id(0) * pl.num_programs(1) + i

        @pl.when(gb < mask_start_block)
        def _fast():                       # common path: no mask cost
            out_ref[...] += fold(contrib)

        @pl.when(gb >= mask_start_block)
        def _edge():
            # Masking by the *virtual* row index zeroes both:
            #  (a) the ragged tail rows of the last real block, and
            #  (b) entire duplicated overshoot blocks (gb >= total_blocks,
            #      whose index_map was clamped to the last real block).
            # Mask applied after the math -> garbage/NaN never reaches the sum.
            row_idx = gb * block_rows + lax.broadcasted_iota(
                jnp.int32, (block_rows, LANES), 0)
            out_ref[...] += fold(jnp.where(row_idx < rows, contrib, 0.0))


def _focal_huber_sum_jnp(yp, yt, delta, alpha, gamma):
    """Tiny pure-jnp sum of focal-Huber terms (tail / tiny-input path)."""
    yp = yp.astype(jnp.float32)
    yt = yt.astype(jnp.float32)
    error = jnp.abs(yt - yp)
    w = 1.0 - jnp.exp(-alpha * error)
    weight = w * w if gamma == 2.0 else jnp.power(w, gamma)
    quadratic = 0.5 * (error * error)
    linear = delta * (error - 0.5 * delta)
    return jnp.sum(weight * jnp.where(error < delta, quadratic, linear))


def focal_huber_loss(y_pred, y_true, *, delta=0.2, alpha=1.0, gamma=2.0,
                     block_rows=2048, num_cores=None):
    """Mean focal-weighted Huber loss over all elements (matches PyTorch).

    block_rows is a sweep parameter (rows of 128 lanes per grid step); default
    2048 rows = 1 MiB/input/step (f32).  The double-buffered footprint plus
    margin is passed as vmem_limit_bytes so 4096-8192-row sweeps on v7x and
    the 16 MiB v5e scoped default are both handled explicitly.

    Note: for non-default gamma the kernel clamps the power base to 1e-30 to
    avoid log(0); this differs from power(0, gamma)=0 only by ~1e-60.
    """
    assert y_pred.shape == y_true.shape
    delta, alpha, gamma = float(delta), float(alpha), float(gamma)
    n_total = y_pred.size

    yp_flat = y_pred.reshape(-1)
    yt_flat = y_true.reshape(-1)

    rows = n_total // LANES          # full 128-lane rows
    tail = n_total - rows * LANES    # < 128 leftover elements

    if rows < 8:
        # Below the (8,128) tile granule: not worth a kernel launch.
        return _focal_huber_sum_jnp(yp_flat, yt_flat, delta, alpha, gamma) / n_total

    if tail:
        # Kernel covers the 128-aligned prefix; the <128-elem tail is a tiny
        # jnp epilogue (see TODO at top about the possible prefix-slice copy).
        yp_main = yp_flat[: rows * LANES].reshape(rows, LANES)
        yt_main = yt_flat[: rows * LANES].reshape(rows, LANES)
    else:
        yp_main = yp_flat.reshape(rows, LANES)   # free reshape, no copy
        yt_main = yt_flat.reshape(rows, LANES)

    itemsize = int(jnp.dtype(y_pred.dtype).itemsize)
    # Cap the double-buffered 2-input footprint at 32 MiB (safe on all chips,
    # incl. v7x's 64 MiB physical VMEM).
    max_block_rows = (32 << 20) // (4 * LANES * itemsize)
    block_rows = min(int(block_rows), rows, max_block_rows)
    block_rows = max(8, (block_rows // 8) * 8)

    total_blocks = pl.cdiv(rows, block_rows)
    if num_cores is None:
        num_cores = _guess_num_tensorcores()
    num_cores = max(1, min(int(num_cores), total_blocks))
    steps = pl.cdiv(total_blocks, num_cores)

    ragged = total_blocks * block_rows != rows        # partial last block?
    overshoot = num_cores * steps != total_blocks     # duplicated blocks?
    if ragged:
        mask_start_block = total_blocks - 1
    elif overshoot:
        mask_start_block = total_blocks
    else:
        mask_start_block = None

    kernel = functools.partial(
        _focal_huber_kernel,
        delta=delta, alpha=alpha, gamma=gamma,
        block_rows=block_rows, rows=rows, mask_start_block=mask_start_block)

    last_block = total_blocks - 1

    def in_map(c, i):
        # Clamp overshoot block ids so the DMA stays in bounds; the kernel's
        # virtual-row-index mask zeroes their contribution.
        return (jnp.minimum(c * steps + i, last_block), 0)

    block_bytes = block_rows * LANES * itemsize
    vmem_limit = int(min(max(4 * block_bytes + (2 << 20), 16 << 20), 48 << 20))

    partials = pl.pallas_call(
        kernel,
        out_shape=jax.ShapeDtypeStruct((num_cores * 8, LANES), jnp.float32),
        grid_spec=pltpu.PrefetchScalarGridSpec(
            num_scalar_prefetch=0,
            grid=(num_cores, steps),
            in_specs=[
                pl.BlockSpec((block_rows, LANES), in_map),
                pl.BlockSpec((block_rows, LANES), in_map),
            ],
            # Per-core resident (8,128) accumulator block (constant over i).
            out_specs=pl.BlockSpec((8, LANES), lambda c, i: (c, 0)),
        ),
        compiler_params=pltpu.CompilerParams(
            dimension_semantics=("parallel", "arbitrary"),
            vmem_limit_bytes=vmem_limit),
    )(yp_main, yt_main)

    total = jnp.sum(partials)
    if tail:
        total = total + _focal_huber_sum_jnp(
            yp_flat[rows * LANES:], yt_flat[rows * LANES:], delta, alpha, gamma)
    return total / n_total


def focal_huber_loss_ref(y_pred, y_true, *, delta=0.2, alpha=1.0, gamma=2.0):
    error = jnp.abs(y_true - y_pred)
    weight = jnp.power(1.0 - jnp.exp(-alpha * error), gamma)
    quadratic = 0.5 * error ** 2
    linear = delta * (error - 0.5 * delta)
    huber = jnp.where(error < delta, quadratic, linear)
    return jnp.mean(weight * huber)


# TODO(synk): optional L1/L2 parameter-regularization branch (requires a model
# with parameters) is not part of the kernel; default regular_type=None path
# is what is implemented.


if __name__ == "__main__":
    key = jax.random.PRNGKey(0)
    k1, k2, k3, k4, k5, k6 = jax.random.split(key, 6)

    # 1) Primary case (NCHW; element count a multiple of 128, single block).
    shape = (2, 4, 16, 16)
    y_pred = jax.random.normal(k1, shape, dtype=jnp.float32)
    y_true = jax.random.normal(k2, shape, dtype=jnp.float32)
    loss = jax.block_until_ready(
        focal_huber_loss(y_pred, y_true, delta=0.2, alpha=1.0, gamma=2.0))
    ref = focal_huber_loss_ref(y_pred, y_true, delta=0.2, alpha=1.0, gamma=2.0)
    assert jnp.allclose(loss, ref, rtol=1e-4, atol=1e-6), (loss, ref)

    # 2) Ragged case: odd block count + partial last block + <128-elem tail
    #    (exercises the masked edge block, clamped overshoot block and the
    #     jnp tail epilogue).
    shape2 = (17, 129)
    yp2 = jax.random.normal(k3, shape2, dtype=jnp.float32)
    yt2 = jax.random.normal(k4, shape2, dtype=jnp.float32)
    loss2 = jax.block_until_ready(focal_huber_loss(yp2, yt2, block_rows=8))
    ref2 = focal_huber_loss_ref(yp2, yt2)
    assert jnp.allclose(loss2, ref2, rtol=1e-4, atol=1e-6), (loss2, ref2)

    # 3) Odd block count, no raggedness: overshoot block fully masked.
    shape3 = (24, 128)
    yp3 = jax.random.normal(k5, shape3, dtype=jnp.float32)
    yt3 = jax.random.normal(k6, shape3, dtype=jnp.float32)
    loss3 = jax.block_until_ready(focal_huber_loss(yp3, yt3, block_rows=8))
    ref3 = focal_huber_loss_ref(yp3, yt3)
    assert jnp.allclose(loss3, ref3, rtol=1e-4, atol=1e-6), (loss3, ref3)

    print("KERNEL_OK")
</pallas_src>

<mosaic_0001>
module attributes {stable_mosaic.version = 11 : i64} {
  func.func @_focal_huber_kernel(%arg0: i32, %arg1: i32, %arg2: memref<16x128xf32, #tpu.memory_space<vmem>>, %arg3: memref<16x128xf32, #tpu.memory_space<vmem>>, %arg4: memref<8x128xf32, #tpu.memory_space<vmem>>) attributes {dimension_semantics = [#tpu.dimension_semantics<parallel>, #tpu.dimension_semantics<arbitrary>], iteration_bounds = array<i64: 1, 1>, scalar_prefetch = 0 : i64, scratch_operands = 0 : i64, tpu.core_type = #tpu.core_type<tc>, window_params = [{transform_indices = @transform_0, window_bounds = array<i64: 16, 128>}, {transform_indices = @transform_1, window_bounds = array<i64: 16, 128>}, {transform_indices = @transform_2, window_bounds = array<i64: 8, 128>}]} {
    %c0_i32 = arith.constant 0 : i32
    %0 = arith.cmpi eq, %arg1, %c0_i32 : i32
    %1 = arith.extui %0 : i1 to i32
    %c0_i32_0 = arith.constant 0 : i32
    %2 = arith.cmpi ne, %1, %c0_i32_0 : i32
    scf.if %2 {
      %cst_14 = arith.constant 0.000000e+00 : f32
      %29 = vector.broadcast %cst_14 : f32 to vector<8x128xf32>
      %c0_15 = arith.constant 0 : index
      %c0_16 = arith.constant 0 : index
      %30 = vector.load %arg4[%c0_15, %c0_16] : memref<8x128xf32, #tpu.memory_space<vmem>>, vector<8x128xf32>
      tpu.vector_store %arg4[%c0_15, %c0_16], %29 {strides = array<i32>} : memref<8x128xf32, #tpu.memory_space<vmem>>, vector<8x128xf32>,
    } else {
    }
    %c0 = arith.constant 0 : index
    %c0_1 = arith.constant 0 : index
    %3 = vector.load %arg2[%c0, %c0_1] : memref<16x128xf32, #tpu.memory_space<vmem>>, vector<16x128xf32>
    %c0_2 = arith.constant 0 : index
    %c0_3 = arith.constant 0 : index
    %4 = vector.load %arg3[%c0_2, %c0_3] : memref<16x128xf32, #tpu.memory_space<vmem>>, vector<16x128xf32>
    %5 = arith.subf %4, %3 : vector<16x128xf32>
    %6 = math.absf %5 : vector<16x128xf32>
    %cst = arith.constant -1.000000e+00 : f32
    %7 = vector.broadcast %cst : f32 to vector<16x128xf32>
    %8 = arith.mulf %7, %6 : vector<16x128xf32>
    %9 = math.exp %8 : vector<16x128xf32>
    %cst_4 = arith.constant 1.000000e+00 : f32
    %10 = vector.broadcast %cst_4 : f32 to vector<16x128xf32>
    %11 = arith.subf %10, %9 : vector<16x128xf32>
    %12 = arith.mulf %11, %11 : vector<16x128xf32>
    %13 = arith.mulf %6, %6 : vector<16x128xf32>
    %cst_5 = arith.constant 5.000000e-01 : f32
    %14 = vector.broadcast %cst_5 : f32 to vector<16x128xf32>
    %15 = arith.mulf %14, %13 : vector<16x128xf32>
    %cst_6 = arith.constant 1.000000e-01 : f32
    %16 = vector.broadcast %cst_6 : f32 to vector<16x128xf32>
    %17 = arith.subf %6, %16 : vector<16x128xf32>
    %cst_7 = arith.constant 2.000000e-01 : f32
    %18 = vector.broadcast %cst_7 : f32 to vector<16x128xf32>
    %19 = arith.mulf %18, %17 : vector<16x128xf32>
    %cst_8 = arith.constant 2.000000e-01 : f32
    %20 = vector.broadcast %cst_8 : f32 to vector<16x128xf32>
    %21 = arith.cmpf olt, %6, %20 : vector<16x128xf32>
    %22 = arith.select %21, %15, %19 : vector<16x128xi1>, vector<16x128xf32>
    %23 = arith.mulf %12, %22 : vector<16x128xf32>
    %c0_9 = arith.constant 0 : index
    %c0_10 = arith.constant 0 : index
    %24 = vector.load %arg4[%c0_9, %c0_10] : memref<8x128xf32, #tpu.memory_space<vmem>>, vector<8x128xf32>
    %25 = vector.shape_cast %23 : vector<16x128xf32> to vector<2x8x128xf32>
    %cst_11 = arith.constant dense<0.000000e+00> : vector<8x128xf32>
    %26 = vector.multi_reduction <add>, %25, %cst_11 [0] : vector<2x8x128xf32> to vector<8x128xf32>
    %27 = arith.addf %24, %26 : vector<8x128xf32>
    %c0_12 = arith.constant 0 : index
    %c0_13 = arith.constant 0 : index
    %28 = vector.load %arg4[%c0_12, %c0_13] : memref<8x128xf32, #tpu.memory_space<vmem>>, vector<8x128xf32>
    tpu.vector_store %arg4[%c0_12, %c0_13], %27 {strides = array<i32>} : memref<8x128xf32, #tpu.memory_space<vmem>>, vector<8x128xf32>,
    return
  }
  func.func @transform_0(%arg0: i32, %arg1: i32) -> (i32, i32) {
    %c1_i32 = arith.constant 1 : i32
    %0 = arith.muli %arg0, %c1_i32 : i32
    %1 = arith.addi %0, %arg1 : i32
    %c0_i32 = arith.constant 0 : i32
    %2 = arith.minsi %1, %c0_i32 : i32
    %c0_i32_0 = arith.constant 0 : i32
    %c0_i32_1 = arith.constant 0 : i32
    return %2, %c0_i32_0 : i32, i32
  }
  func.func @transform_1(%arg0: i32, %arg1: i32) -> (i32, i32) {
    %c1_i32 = arith.constant 1 : i32
    %0 = arith.muli %arg0, %c1_i32 : i32
    %1 = arith.addi %0, %arg1 : i32
    %c0_i32 = arith.constant 0 : i32
    %2 = arith.minsi %1, %c0_i32 : i32
    %c0_i32_0 = arith.constant 0 : i32
    %c0_i32_1 = arith.constant 0 : i32
    return %2, %c0_i32_0 : i32, i32
  }
  func.func @transform_2(%arg0: i32, %arg1: i32) -> (i32, i32) {
    %c0_i32 = arith.constant 0 : i32
    %c0_i32_0 = arith.constant 0 : i32
    return %arg0, %c0_i32 : i32, i32
  }
}

</mosaic_0001>

<bundles_post_ra>
// kernel: tpu_custom_call.1
= control target key start
LH: loop header
LB: loop body
LE: loop exit
PB: predicated region body
PF: predicated region fallthrough
CT: control target
= control target key end

     0   :  { %7 = vsyncpa [#allocation3], 0  ;;  %s246_s0 = inlined_call_operand.hbm [shape: f32[16,128], index: 0, kind: input, shape index: {}]   ;;  %s247_s1 = inlined_call_operand.hbm [shape: f32[16,128], index: 1, kind: input, shape index: {}]   ;;  %s248_s2 = inlined_call_operand.hbm [shape: f32[8,128], index: 2, kind: output, shape index: {}]  }
   0x1   :  { %8 = vsyncpa [#allocation6], 0 }
   0x2   :  { %9 = vsyncpa [#allocation4], 0  ;;  %s20_s11 = sshll.u32 %s246_s0, 4  ;;  %s217_s12 = smov [#allocation2]   ;;  %s21_s11 = int_to_ptr.hbm [resolvable:$true] %s20_s11 }
   0x3   :  { %s22_s13 = sshll.u32 %s217_s12, 4  ;;  %s39_s16 = sshll.u32 %s247_s1, 4  ;;  %s23_s13 = int_to_ptr.vmem [resolvable:$true] %s22_s13  ;;  %s40_s16 = int_to_ptr.hbm [resolvable:$true] %s39_s16 }
   0x4   :  { %s218_s17 = smov 128   ;;  %s219_s18 = smov 8  }
   0x5   :  { %28 = dma.hbm_to_vmem [thread:$0]  %s21_s11, 256, %s23_s13, [#allocation3], %s218_s17, %s218_s17, %s219_s18  }
   0x6   :  { %s220_s19 = smov [#allocation5]  }
   0x7   :  { %s41_s20 = sshll.u32 %s220_s19, 4  ;;  %s42_s20 = int_to_ptr.vmem [resolvable:$true] %s41_s20 }
   0x8   :  { %47 = dma.hbm_to_vmem [thread:$0]  %s40_s16, 256, %s42_s20, [#allocation6], %s218_s17, %s218_s17, %s219_s18  }
   0x9   :  { %211 = dma.done.wait [#allocation3], 256  }
   0xa   :  { %212 = vsyncadd [#allocation3], 4294967040 }
   0xb   :  { %213 = dma.done.wait [#allocation6], 256  }
   0xc   :  { %214 = vsyncadd [#allocation6], 4294967040  ;;  %v69_v0 = vld [vmem:[#allocation2] sm:$0xff]  ;;  %v70_v1 = vld [vmem:[#allocation2 + $0x8] sm:$0xff]  ;;  %s221_s0 = smov [#allocation7]   ;;  %s112_s23 = sshll.u32 %s248_s2, 4  ;;  %s113_s23 = int_to_ptr.hbm [resolvable:$true] %s112_s23 }
   0xd   :  { %v71_v2 = vld [vmem:[#allocation5] sm:$0xff]  ;;  %v72_v3 = vld [vmem:[#allocation5 + $0x8] sm:$0xff]  ;;  %s110_s1 = sshll.u32 %s221_s0, 4  ;;  %s111_s1 = int_to_ptr.vmem [resolvable:$true] %s110_s1 }
   0xe   :  { %v73_v4 = vsub.f32 %v71_v2, %v69_v0  ;;  %v74_v5 = vsub.f32 %v72_v3, %v70_v1 }
  0x10   :  { %v75_v6 = vand.u32 2147483647, %v73_v4  ;;  %v76_v7 = vand.u32 2147483647, %v74_v5 }
  0x12   :  { %v77_v8 = vmul.f32 -1.0, %v75_v6  ;;  %v78_v9 = vmul.f32 -1.0, %v76_v7  ;;  %v87_v12 = vmul.f32 %v75_v6, %v75_v6  ;;  %v127_v13 = vadd.f32 -0.1, %v75_v6 }
  0x13   :  { %v88_v14 = vmul.f32 %v76_v7, %v76_v7  ;;  %v128_v15 = vadd.f32 -0.1, %v76_v7  ;;  %vm95_vm0 = vcmp.lt.f32.partialorder %v75_v6, 0.2  ;;  %vm96_vm1 = vcmp.lt.f32.partialorder %v76_v7, 0.2 }
  0x14   :  { %v79_v10 = vmul.f32 1.442695, %v77_v8  ;;  %v81_v11 = vmul.f32 1.442695, %v78_v9  ;;  %v89_v16 = vmul.f32 0.5, %v87_v12 }
  0x15   :  { %v93_v17 = vmul.f32 0.2, %v127_v13  ;;  %v90_v18 = vmul.f32 0.5, %v88_v14  ;;  %v94_v19 = vmul.f32 0.2, %v128_v15 }
  0x16   :  { %135 = vpow2.f32 %v79_v10 }
  0x17   :  { %137 = vpow2.f32 %v81_v11  ;;  %v97_v24 = vsel %vm95_vm0, %v89_v16, %v93_v17  ;;  %v98_v26 = vsel %vm96_vm1, %v90_v18, %v94_v19 }
  0x1c   :  { %v136_v20 = vpop.eup %135 }
  0x1d   :  { %v138_v21 = vpop.eup %137  ;;  %v83_v22 = vsub.f32 1.0, %v136_v20 }
  0x1e   :  { %v84_v23 = vsub.f32 1.0, %v138_v21 }
  0x1f   :  { %v85_v25 = vmul.f32 %v83_v22, %v83_v22 }
  0x20   :  { %v86_v27 = vmul.f32 %v84_v23, %v84_v23 }
  0x21   :  { %v99_v28 = vmul.f32 %v97_v24, %v85_v25 }
  0x22   :  { %v100_v29 = vmul.f32 %v98_v26, %v86_v27 }
  0x24   :  { %v102_v30 = vadd.f32 %v100_v29, %v99_v28 }
  0x26   :  { %104 = vst [vmem:[#allocation7] sm:$0xff] %v102_v30 }
  0x27   :  { %115 = dma.vmem_to_hbm [thread:$0]  %s111_s1, 128, %s113_s23, [#allocation4]  }
  0x28   :  { %215 = dma.done.wait [#allocation4], 128  }
  0x29   :  { %216 = vsyncadd [#allocation4], 4294967168 }
  0x2a   :  { %120 = vsyncpa [#allocation3], 1 }
  0x2b   :  { %121 = vsyncpa [#allocation6], 1 }
  0x2c   :  { %122 = vsyncpa [#allocation4], 1 }

</bundles_post_ra>
